<compile_context>
chip_gen: v7x
topology: tpu7x:2x2x1
jax: 0.10.0
libtpu: 0.0.40
codegen_flags: <defaults>
</compile_context>

<pallas_src>
import functools

import jax
import jax.numpy as jnp
from jax.experimental import pallas as pl
from jax.experimental.pallas import tpu as pltpu

LANE = 128  # lane width (last dim)


def _round_up(n, m):
    return (n + m - 1) // m * m


def _cdiv(a, b):
    return (a + b - 1) // b


def _min_sublane_rows(compute_dtype):
    # Native sublane tile: (8,128) f32, (16,128) bf16, (32,128) int8/fp8.
    itemsize = jnp.dtype(compute_dtype).itemsize
    return {4: 8, 2: 16, 1: 32}.get(itemsize, 8)


def _device_kind():
    try:
        return jax.devices()[0].device_kind.lower()
    except Exception:
        return ""


def _default_vmem_limit_bytes():
    cap = None
    try:
        cap = int(getattr(pltpu.get_tpu_info(), "vmem_capacity_bytes"))
    except Exception:
        cap = None
    if cap is None:
        kind = _device_kind()
        cap = 64 * 1024 * 1024 if "v7" in kind else 128 * 1024 * 1024
    # ~0.75 * physical capacity: ~96 MiB on v5e/v6e (128 MiB), ~48 MiB on v7x (64 MiB/TC).
    return int(0.75 * cap)


def _num_tensorcores():
    # v7x exposes 2 TensorCores per chip; earlier inference chips behave as 1.
    return 2 if "v7" in _device_kind() else 1


def _default_bf16_epilogue():
    kind = _device_kind()
    if not kind:
        return False
    # v5e and earlier have no bf16 VALUs; keep the f32 epilogue there.
    return not any(t in kind for t in ("v2", "v3", "v4", "v5"))


def _fused_mlp_kernel(*refs, num_layers, compute_dtype, bf16_epilogue):
    """Fused y = relu(...relu(x @ W0 + b0)...) on one batch tile.

    refs = (x_ref, w0, b0, w1, b1, ..., w_{L-1}, b_{L-1}, o_ref).
    The layer loop is unrolled at trace time, so intermediate activations stay
    in vregs/VMEM (no HBM traffic).
    """
    x_ref = refs[0]
    o_ref = refs[1 + 2 * num_layers]

    h = x_ref[...].astype(compute_dtype)  # cast f32 -> bf16 in-kernel (no host pass)
    for l in range(num_layers):
        w_ref = refs[1 + 2 * l]
        b_ref = refs[2 + 2 * l]
        acc = jnp.dot(h, w_ref[...], preferred_element_type=jnp.float32)  # MXU, f32 acc
        last = (l + 1 == num_layers)
        if last:
            a = jnp.maximum(acc + b_ref[...], 0.0)  # f32 epilogue on the final layer
            o_ref[...] = a.astype(o_ref.dtype)
        elif bf16_epilogue:
            # v6e/v7x: bias-add + ReLU in compute dtype (halves VALU / vreg traffic).
            a = acc.astype(compute_dtype) + b_ref[...].astype(compute_dtype)
            h = jnp.maximum(a, 0)
        else:
            h = jnp.maximum(acc + b_ref[...], 0.0).astype(compute_dtype)


def _choose_block_rows(d_in, padded_params, compute_dtype, out_itemsize,
                       vmem_limit_bytes, min_rows):
    """Largest power-of-two batch tile (<=1024, >=min_rows) fitting the VMEM budget."""
    act_itemsize = jnp.dtype(compute_dtype).itemsize
    hidden_pads = [w.shape[1] for (w, _) in padded_params]
    # Weights/biases are SINGLE-buffered VMEM residents -> counted once.
    weight_bytes = sum(w.size * w.dtype.itemsize + b.size * b.dtype.itemsize
                       for (w, b) in padded_params)
    widest = max(hidden_pads)
    per_row = (2 * d_in * 4                              # double-buffered f32 input tile
               + 2 * hidden_pads[-1] * out_itemsize      # double-buffered output tile
               + widest * (4 + act_itemsize))            # f32 acc + compute-dtype copy live
    budget = int(0.8 * vmem_limit_bytes) - weight_bytes
    rows = 1024
    while rows > min_rows and rows * per_row > budget:
        rows //= 2
    return max(min_rows, rows)


def deep_network_forward(x, padded_params, *, out_dim, compute_dtype=jnp.bfloat16,
                         block_rows=None, out_dtype=jnp.float32,
                         bf16_epilogue=None, vmem_limit_bytes=None):
    """Run the fused Linear+ReLU stack as a single Pallas kernel.

    x: (B, D_in) float32 (unpadded, un-copied).
    padded_params: list of (w_pad[compute_dtype], b_pad[f32, (1, H_pad)]) where the
      first layer's weight keeps the true D_in contraction dim and every layer's
      output dim is padded to a multiple of 128.
    returns: (B, out_dim) out_dtype.
    """
    if not padded_params:
        return x

    B, D_in = x.shape
    num_layers = len(padded_params)
    D_out_pad = padded_params[-1][0].shape[1]
    assert padded_params[0][0].shape[0] == D_in, "first-layer weight K must equal D_in"

    if vmem_limit_bytes is None:
        vmem_limit_bytes = _default_vmem_limit_bytes()
    if bf16_epilogue is None:
        bf16_epilogue = _default_bf16_epilogue()

    min_rows = _min_sublane_rows(compute_dtype)
    out_itemsize = jnp.dtype(out_dtype).itemsize

    if block_rows is None:
        rows = _choose_block_rows(D_in, padded_params, compute_dtype, out_itemsize,
                                  vmem_limit_bytes, min_rows)
        TB = min(rows, _round_up(B, min_rows))
        # v7x: push the tile count to a multiple of #cores so both TCs get work.
        cores = _num_tensorcores()
        if cores > 1 and B > min_rows:
            tiles = _cdiv(B, TB)
            target = _round_up(tiles, cores)
            if target != tiles:
                TB = max(min_rows, _round_up(_cdiv(B, target), min_rows))
    else:
        TB = max(min_rows, _round_up(block_rows, min_rows))
        TB = min(TB, _round_up(B, min_rows))

    grid = (_cdiv(B, TB),)   # partial last tile is masked by Pallas; rows are independent

    in_specs = [pl.BlockSpec((TB, D_in), lambda i: (i, 0))]
    flat_inputs = [x]
    weight_bytes = 0
    for (w_p, b_p) in padded_params:
        # Whole-array, single-buffered VMEM residents (no per-step re-DMA, no 2x buffers).
        in_specs.append(pl.BlockSpec(memory_space=pltpu.MemorySpace.VMEM))
        in_specs.append(pl.BlockSpec(memory_space=pltpu.MemorySpace.VMEM))
        flat_inputs.extend([w_p, b_p])
        weight_bytes += w_p.size * w_p.dtype.itemsize + b_p.size * b_p.dtype.itemsize

    flops = 2 * B * sum(int(w.shape[0]) * int(w.shape[1]) for (w, _) in padded_params)
    bytes_accessed = (B * D_in * x.dtype.itemsize + weight_bytes
                      + B * D_out_pad * out_itemsize)

    kernel = functools.partial(_fused_mlp_kernel, num_layers=num_layers,
                               compute_dtype=compute_dtype, bf16_epilogue=bf16_epilogue)

    out = pl.pallas_call(
        kernel,
        out_shape=jax.ShapeDtypeStruct((B, D_out_pad), out_dtype),
        grid=grid,
        in_specs=in_specs,
        out_specs=pl.BlockSpec((TB, D_out_pad), lambda i: (i, 0)),
        compiler_params=pltpu.CompilerParams(
            dimension_semantics=("parallel",),          # megacore sharding on v7x
            vmem_limit_bytes=int(vmem_limit_bytes),
        ),
        cost_estimate=pl.CostEstimate(flops=flops, transcendentals=0,
                                      bytes_accessed=int(bytes_accessed)),
    )(*flat_inputs)

    if out_dim == D_out_pad:
        return out
    # Narrow slice of the (lane-dense-stored) final layer only; left to XLA so it can
    # fuse into the consumer (final_linear_layer in DCNv2) instead of a second pass.
    return out[:, :out_dim]


class DeepNetwork:
    """JAX/Pallas port of the PyTorch DeepNetwork module (forward only)."""

    def __init__(self, input_dim, hidden_dims, dropout_rate=0.0, key=None,
                 compute_dtype=jnp.bfloat16):
        if key is None:
            key = jax.random.PRNGKey(0)
        self.input_dim = input_dim
        self.hidden_dims = list(hidden_dims)
        self.dropout_rate = dropout_rate
        self.compute_dtype = compute_dtype
        self.bf16_epilogue = _default_bf16_epilogue()
        # TODO(synk): train-mode Dropout not implemented; eval-mode dropout is identity.

        self.params = []          # f32, unpadded (source of truth)
        self.padded_params = []   # pre-cast + pre-padded once (lane-dense, VMEM-resident)
        d_in = input_dim
        for li, h in enumerate(self.hidden_dims):
            key, kw, kb = jax.random.split(key, 3)
            # Mimic nn.Linear's U(-1/sqrt(fan_in), 1/sqrt(fan_in)) init.
            bound = 1.0 / float(d_in) ** 0.5
            w = jax.random.uniform(kw, (d_in, h), jnp.float32, -bound, bound)
            b = jax.random.uniform(kb, (h,), jnp.float32, -bound, bound)
            self.params.append((w, b))

            h_pad = _round_up(h, LANE)
            # First layer keeps the true contraction dim (matches the unpadded x tile);
            # later layers' K equals the previous layer's padded output dim.
            k_dim = d_in if li == 0 else _round_up(d_in, LANE)
            w_pad = jnp.zeros((k_dim, h_pad), compute_dtype)
            w_pad = w_pad.at[:d_in, :h].set(w.astype(compute_dtype))
            b_pad = jnp.zeros((1, h_pad), jnp.float32).at[:, :h].set(b)
            self.padded_params.append((w_pad, b_pad))
            d_in = h

    def __call__(self, x, *, block_rows=None, out_dtype=jnp.float32):
        return deep_network_forward(
            x, self.padded_params,
            out_dim=self.hidden_dims[-1],
            compute_dtype=self.compute_dtype,
            block_rows=block_rows,
            out_dtype=out_dtype,
            bf16_epilogue=self.bf16_epilogue,
        )


def reference_forward(params, x, compute_dtype=jnp.bfloat16, bf16_epilogue=False):
    """Plain-JAX reference matching the kernel's bf16-matmul / f32-accumulate path."""
    h = x.astype(compute_dtype)
    n = len(params)
    for l, (w, b) in enumerate(params):
        acc = jnp.dot(h, w.astype(compute_dtype), preferred_element_type=jnp.float32)
        last = (l + 1 == n)
        if last:
            h = jnp.maximum(acc + b, 0.0)
        elif bf16_epilogue:
            h = jnp.maximum(acc.astype(compute_dtype) + b.astype(compute_dtype), 0)
        else:
            h = jnp.maximum(acc + b, 0.0).astype(compute_dtype)
    return h


if __name__ == "__main__":
    key = jax.random.PRNGKey(0)
    k_x, k_params = jax.random.split(key)

    batch = 64
    input_dim = 40            # not a multiple of 128 -> exercises the narrow-K first layer
    hidden_dims = [64, 32]    # scaled-down deep_hidden_dims

    x = jax.random.normal(k_x, (batch, input_dim), jnp.float32)
    net = DeepNetwork(input_dim, hidden_dims, dropout_rate=0.0, key=k_params)

    ref = reference_forward(net.params, x, compute_dtype=net.compute_dtype,
                            bf16_epilogue=net.bf16_epilogue)

    # Auto-chosen batch tile (per-generation VMEM budget / core-count heuristics).
    out_auto = jax.block_until_ready(net(x))
    assert out_auto.shape == (batch, hidden_dims[-1]), out_auto.shape
    assert jnp.allclose(out_auto, ref, atol=1e-2, rtol=1e-2), "auto-tile mismatch vs reference"

    # Explicit small tile -> grid=(4,): exercises batch pipelining, the parallel axis,
    # and the partial/masked-tile machinery indirectly.
    out_tiled = jax.block_until_ready(net(x, block_rows=16))
    assert out_tiled.shape == (batch, hidden_dims[-1]), out_tiled.shape
    assert jnp.allclose(out_tiled, ref, atol=1e-2, rtol=1e-2), "tiled mismatch vs reference"

    print("KERNEL_OK")
</pallas_src>

<mosaic_0001>
module attributes {stable_mosaic.version = 11 : i64} {
  func.func @_fused_mlp_kernel(%arg0: i32, %arg1: memref<64x40xf32, #tpu.memory_space<vmem>>, %arg2: memref<40x128xbf16, #tpu.memory_space<vmem>>, %arg3: memref<1x128xf32, #tpu.memory_space<vmem>>, %arg4: memref<128x128xbf16, #tpu.memory_space<vmem>>, %arg5: memref<1x128xf32, #tpu.memory_space<vmem>>, %arg6: memref<64x128xf32, #tpu.memory_space<vmem>>) attributes {dimension_semantics = [#tpu.dimension_semantics<parallel>], iteration_bounds = array<i64: 1>, scalar_prefetch = 0 : i64, scratch_operands = 0 : i64, tpu.core_type = #tpu.core_type<tc>, window_params = [{transform_indices = @transform_0, window_bounds = array<i64: 64, 40>}, {pipeline_mode = #tpu.pipeline_mode<synchronous>, transform_indices = @transform_1, window_bounds = array<i64: 40, 128>}, {pipeline_mode = #tpu.pipeline_mode<synchronous>, transform_indices = @transform_2, window_bounds = array<i64: 1, 128>}, {pipeline_mode = #tpu.pipeline_mode<synchronous>, transform_indices = @transform_3, window_bounds = array<i64: 128, 128>}, {pipeline_mode = #tpu.pipeline_mode<synchronous>, transform_indices = @transform_4, window_bounds = array<i64: 1, 128>}, {transform_indices = @transform_5, window_bounds = array<i64: 64, 128>}]} {
    %c0 = arith.constant 0 : index
    %c0_0 = arith.constant 0 : index
    %0 = vector.load %arg1[%c0, %c0_0] : memref<64x40xf32, #tpu.memory_space<vmem>>, vector<64x40xf32>
    %1 = arith.truncf %0 : vector<64x40xf32> to vector<64x40xbf16>
    %c0_1 = arith.constant 0 : index
    %c0_2 = arith.constant 0 : index
    %2 = vector.load %arg2[%c0_1, %c0_2] : memref<40x128xbf16, #tpu.memory_space<vmem>>, vector<40x128xbf16>
    %cst = arith.constant dense<0.000000e+00> : vector<64x128xf32>
    %3 = tpu.matmul %1, %2, %cst {dimension_numbers = #tpu.dot_dimension_numbers<[1], [0], [0], [1], [0, 0, 1, 1], [], []>} : vector<64x40xbf16>, vector<40x128xbf16>, vector<64x128xf32> -> vector<64x128xf32>
    %4 = arith.truncf %3 : vector<64x128xf32> to vector<64x128xbf16>
    %c0_3 = arith.constant 0 : index
    %c0_4 = arith.constant 0 : index
    %5 = vector.load %arg3[%c0_3, %c0_4] : memref<1x128xf32, #tpu.memory_space<vmem>>, vector<1x128xf32>
    %6 = arith.truncf %5 : vector<1x128xf32> to vector<1x128xbf16>
    %7 = vector.broadcast %6 : vector<1x128xbf16> to vector<64x128xbf16>
    %8 = arith.addf %4, %7 : vector<64x128xbf16>
    %cst_5 = arith.constant 0.000000e+00 : bf16
    %9 = vector.broadcast %cst_5 : bf16 to vector<64x128xbf16>
    %10 = arith.maximumf %8, %9 : vector<64x128xbf16>
    %c0_6 = arith.constant 0 : index
    %c0_7 = arith.constant 0 : index
    %11 = vector.load %arg4[%c0_6, %c0_7] : memref<128x128xbf16, #tpu.memory_space<vmem>>, vector<128x128xbf16>
    %cst_8 = arith.constant dense<0.000000e+00> : vector<64x128xf32>
    %12 = tpu.matmul %10, %11, %cst_8 {dimension_numbers = #tpu.dot_dimension_numbers<[1], [0], [0], [1], [0, 0, 1, 1], [], []>} : vector<64x128xbf16>, vector<128x128xbf16>, vector<64x128xf32> -> vector<64x128xf32>
    %c0_9 = arith.constant 0 : index
    %c0_10 = arith.constant 0 : index
    %13 = vector.load %arg5[%c0_9, %c0_10] : memref<1x128xf32, #tpu.memory_space<vmem>>, vector<1x128xf32>
    %14 = vector.broadcast %13 : vector<1x128xf32> to vector<64x128xf32>
    %15 = arith.addf %12, %14 : vector<64x128xf32>
    %cst_11 = arith.constant 0.000000e+00 : f32
    %16 = vector.broadcast %cst_11 : f32 to vector<64x128xf32>
    %17 = arith.maximumf %15, %16 : vector<64x128xf32>
    %c0_12 = arith.constant 0 : index
    %c0_13 = arith.constant 0 : index
    %18 = vector.load %arg6[%c0_12, %c0_13] : memref<64x128xf32, #tpu.memory_space<vmem>>, vector<64x128xf32>
    tpu.vector_store %arg6[%c0_12, %c0_13], %17 {strides = array<i32>} : memref<64x128xf32, #tpu.memory_space<vmem>>, vector<64x128xf32>,
    return
  }
  func.func @transform_0(%arg0: i32) -> (i32, i32) {
    %c0_i32 = arith.constant 0 : i32
    %c0_i32_0 = arith.constant 0 : i32
    return %arg0, %c0_i32 : i32, i32
  }
  func.func @transform_1(%arg0: i32) -> (i32, i32) {
    %c0_i32 = arith.constant 0 : i32
    %c0_i32_0 = arith.constant 0 : i32
    %c0_i32_1 = arith.constant 0 : i32
    return %c0_i32, %c0_i32_0 : i32, i32
  }
  func.func @transform_2(%arg0: i32) -> (i32, i32) {
    %c0_i32 = arith.constant 0 : i32
    %c0_i32_0 = arith.constant 0 : i32
    %c0_i32_1 = arith.constant 0 : i32
    return %c0_i32, %c0_i32_0 : i32, i32
  }
  func.func @transform_3(%arg0: i32) -> (i32, i32) {
    %c0_i32 = arith.constant 0 : i32
    %c0_i32_0 = arith.constant 0 : i32
    %c0_i32_1 = arith.constant 0 : i32
    return %c0_i32, %c0_i32_0 : i32, i32
  }
  func.func @transform_4(%arg0: i32) -> (i32, i32) {
    %c0_i32 = arith.constant 0 : i32
    %c0_i32_0 = arith.constant 0 : i32
    %c0_i32_1 = arith.constant 0 : i32
    return %c0_i32, %c0_i32_0 : i32, i32
  }
  func.func @transform_5(%arg0: i32) -> (i32, i32) {
    %c0_i32 = arith.constant 0 : i32
    %c0_i32_0 = arith.constant 0 : i32
    return %arg0, %c0_i32 : i32, i32
  }
}

</mosaic_0001>

<bundles_post_ra>
// kernel: tpu_custom_call.1
= control target key start
LH: loop header
LB: loop body
LE: loop exit
PB: predicated region body
PF: predicated region fallthrough
CT: control target
= control target key end

     0   :  { %10 = vsyncpa [#allocation3], 0  ;;  %s751_s0 = inlined_call_operand.hbm [shape: f32[64,40], index: 0, kind: input, shape index: {}]   ;;  %s752_s1 = inlined_call_operand.hbm [shape: bf16[40,128], index: 1, kind: input, shape index: {}]   ;;  %s753_s2 = inlined_call_operand.hbm [shape: f32[1,128], index: 2, kind: input, shape index: {}]   ;;  %s754_s3 = inlined_call_operand.hbm [shape: bf16[128,128], index: 3, kind: input, shape index: {}]   ;;  %s755_s4 = inlined_call_operand.hbm [shape: f32[1,128], index: 4, kind: input, shape index: {}]   ;;  %s756_s5 = inlined_call_operand.hbm [shape: f32[64,128], index: 5, kind: output, shape index: {}]  }
   0x1   :  { %11 = vsyncpa [#allocation6], 0 }
   0x2   :  { %12 = vsyncpa [#allocation9], 0 }
   0x3   :  { %13 = vsyncpa [#allocation4], 0  ;;  %s628_s18 = smov [#allocation5]   ;;  %s488_s22 = scalar_lea.hbm %s752_s1, 320 }
   0x4   :  { %s31_s19 = sshll.u32 %s628_s18, 4  ;;  %p489_p0 = scmp.ne.s32.totalorder %s752_s1, %s488_s22  ;;  %s32_s19 = int_to_ptr.vmem [resolvable:$true] %s31_s19 }
   0x5   :  { %p492_p1 = scmp.lt.u32.totalorder %s488_s22, %s752_s1 }
   0x7   :  { %p494_p2 = pnand %p492_p1, %p489_p0 }
   0x9   :  { %497 = shalt.err (!%p494_p2)
}
   0xa   :  { %s498_s27 = scalar_lea.vmem %s32_s19, 320  ;;  %p503_p4 = scmp.lt.s32.totalorder %s32_s19, %s32_s19 }
   0xb   :  { %p499_p3 = scmp.ne.s32.totalorder %s32_s19, %s498_s27  ;;  %p504_p5 = scmp.lt.s32.totalorder %s498_s27, %s498_s27 }
   0xd   :  { %p505_p6 = por %p504_p5, %p503_p4 }
   0xf   :  { %p506_p7 = pnand %p505_p6, %p499_p3 }
  0x11   :  { %509 = shalt.err (!%p506_p7)
}
  0x12   :  { %s629_s28 = smov 64   ;;  %s630_s29 = smov 4  }
  0x13   :  { %37 = dma.hbm_to_vmem [thread:$0]  %s752_s1, 320, %s32_s19, [#allocation6], %s629_s28, %s629_s28, %s630_s29  }
  0x14   :  { %s631_s7 = smov [#allocation8]   ;;  %s632_s9 = smov [#allocation2]  }
  0x15   :  { %s53_s8 = sshll.u32 %s631_s7, 4  ;;  %s19_s10 = sshll.u32 %s632_s9, 4  ;;  %s54_s8 = int_to_ptr.vmem [resolvable:$true] %s53_s8  ;;  %s20_s10 = int_to_ptr.vmem [resolvable:$true] %s19_s10 }
  0x16   :  { %s510_s13 = scalar_lea.hbm %s754_s3, 1024 }
  0x17   :  { %p511_p8 = scmp.ne.s32.totalorder %s754_s3, %s510_s13  ;;  %p514_p9 = scmp.lt.u32.totalorder %s510_s13, %s754_s3 }
  0x19   :  { %p516_p10 = pnand %p514_p9, %p511_p8 }
  0x1b   :  { %519 = shalt.err (!%p516_p10)
}
  0x1c   :  { %s520_s1 = scalar_lea.vmem %s54_s8, 1024  ;;  %p525_p12 = scmp.lt.s32.totalorder %s54_s8, %s54_s8 }
  0x1d   :  { %p521_p11 = scmp.ne.s32.totalorder %s54_s8, %s520_s1  ;;  %p526_p13 = scmp.lt.s32.totalorder %s520_s1, %s520_s1 }
  0x1f   :  { %p527_p0 = por %p526_p13, %p525_p12 }
  0x21   :  { %p528_p1 = pnand %p527_p0, %p521_p11 }
  0x23   :  { %531 = shalt.err (!%p528_p1)
}
  0x24   :  { %59 = dma.hbm_to_vmem [thread:$0]  %s754_s3, 1024, %s54_s8, [#allocation9], %s629_s28, %s629_s28, %s630_s29  }
  0x25   :  { %s532_s22 = scalar_lea.hbm %s751_s0, 1024 }
  0x26   :  { %p533_p2 = scmp.ne.s32.totalorder %s751_s0, %s532_s22  ;;  %p536_p3 = scmp.lt.u32.totalorder %s532_s22, %s751_s0 }
  0x28   :  { %p538_p4 = pnand %p536_p3, %p533_p2 }
  0x2a   :  { %541 = shalt.err (!%p538_p4)
}
  0x2b   :  { %s542_s27 = scalar_lea.vmem %s20_s10, 1024  ;;  %p547_p6 = scmp.lt.s32.totalorder %s20_s10, %s20_s10 }
  0x2c   :  { %p543_p5 = scmp.ne.s32.totalorder %s20_s10, %s542_s27  ;;  %p548_p7 = scmp.lt.s32.totalorder %s542_s27, %s542_s27 }
  0x2e   :  { %p549_p8 = por %p548_p7, %p547_p6 }
  0x30   :  { %p550_p9 = pnand %p549_p8, %p543_p5 }
  0x32   :  { %553 = shalt.err (!%p550_p9)
}
  0x33   :  { %s633_s3 = smov 128   ;;  %s634_s28 = smov 8  }
  0x34   :  { %25 = dma.hbm_to_vmem [thread:$0]  %s751_s0, 1024, %s20_s10, [#allocation3], %s633_s3, %s633_s3, %s634_s28  }
  0x35   :  { %s635_s6 = smov [#allocation7]   ;;  %s636_s8 = smov [#allocation10]  }
  0x36   :  { %s44_s7 = sshll.u32 %s635_s6, 4  ;;  %s66_s9 = sshll.u32 %s636_s8, 4  ;;  %s45_s7 = int_to_ptr.vmem [resolvable:$true] %s44_s7  ;;  %s67_s9 = int_to_ptr.vmem [resolvable:$true] %s66_s9 }
  0x37   :  { %s554_s13 = scalar_lea.hbm %s753_s2, 16 }
  0x38   :  { %p555_p10 = scmp.ne.s32.totalorder %s753_s2, %s554_s13  ;;  %p558_p11 = scmp.lt.u32.totalorder %s554_s13, %s753_s2 }
  0x3a   :  { %p560_p12 = pnand %p558_p11, %p555_p10 }
  0x3c   :  { %563 = shalt.err (!%p560_p12)
}
  0x3d   :  { %s564_s0 = scalar_lea.vmem %s45_s7, 16  ;;  %s568_s10 = scalar_lea.vmem %s45_s7, 32 }
  0x3e   :  { %p565_p13 = scmp.ne.s32.totalorder %s45_s7, %s564_s0  ;;  %p569_p0 = scmp.lt.s32.totalorder %s45_s7, %s45_s7 }
  0x3f   :  { %p570_p1 = scmp.lt.s32.totalorder %s568_s10, %s564_s0 }
  0x41   :  { %p571_p2 = por %p570_p1, %p569_p0 }
  0x43   :  { %p572_p3 = pnand %p571_p2, %p565_p13 }
  0x45   :  { %575 = shalt.err (!%p572_p3)
}
  0x46   :  { %47 = dma.hbm_to_vmem [thread:$0]  %s753_s2, 16, %s45_s7, [#allocation6]  }
  0x47   :  { %s576_s21 = scalar_lea.hbm %s755_s4, 16 }
  0x48   :  { %p577_p4 = scmp.ne.s32.totalorder %s755_s4, %s576_s21  ;;  %p580_p5 = scmp.lt.u32.totalorder %s576_s21, %s755_s4 }
  0x4a   :  { %p582_p6 = pnand %p580_p5, %p577_p4 }
  0x4c   :  { %585 = shalt.err (!%p582_p6)
}
  0x4d   :  { %s586_s26 = scalar_lea.vmem %s67_s9, 16  ;;  %s590_s27 = scalar_lea.vmem %s67_s9, 32 }
  0x4e   :  { %p587_p7 = scmp.ne.s32.totalorder %s67_s9, %s586_s26  ;;  %p591_p8 = scmp.lt.s32.totalorder %s67_s9, %s67_s9 }
  0x4f   :  { %p592_p9 = scmp.lt.s32.totalorder %s590_s27, %s586_s26 }
  0x51   :  { %p593_p10 = por %p592_p9, %p591_p8 }
  0x53   :  { %p594_p11 = pnand %p593_p10, %p587_p7 }
  0x55   :  { %597 = shalt.err (!%p594_p11)
}
  0x56   :  { %69 = dma.hbm_to_vmem [thread:$0]  %s755_s4, 16, %s67_s9, [#allocation9]  }
  0x57   :  { %620 = dma.done.wait [#allocation3], 1024  }
  0x58   :  { %621 = vsyncadd [#allocation3], 4294966272 }
  0x59   :  { %622 = dma.done.wait [#allocation6], 336  }
  0x5a   :  { %623 = vsyncadd [#allocation6], 4294966960 }
  0x5b   :  { %624 = dma.done.wait [#allocation9], 1040  }
  0x5c   :  { %625 = vsyncadd [#allocation9], 4294966256  ;;  %v477_v0 = vld [vmem:[#allocation5] sm:$0xff]   ;;  %v478_v1 = vld [vmem:[#allocation5 + $0x8] sm:$0xff]   ;;  %vm118_vm0 = vcmask 326656   ;;  %vm131_vm1 = vcmask 1043456   ;;  %v209_v24 = vlaneseq }
  0x5d   :  { %427 = vmatprep.subr.bf16.mxu0 %v477_v0  ;;  %v86_v2 = vld [vmem:[#allocation2] sm:$0xff]  ;;  %v87_v3 = vld [vmem:[#allocation2 + $0x8] sm:$0xff]  ;;  %v479_v4 = vld [vmem:[#allocation5 + $0x10] ss:$0 sps:$4 sm:$0xff]   ;;  %v637_v40 = vmov 0   ;;  %s638_s4 = smov [#allocation11]  }
  0x5e   :  { %428 = vmatpush3.bf16.msra.mxu0 %v477_v0  ;;  %v94_v5 = vpack.c.bf16 %v87_v3, %v86_v2  ;;  %v88_v6 = vld [vmem:[#allocation2 + $0x10] sm:$0xff]  ;;  %v89_v7 = vld [vmem:[#allocation2 + $0x18] sm:$0xff]  ;;  %v90_v8 = vld [vmem:[#allocation2 + $0x20] sm:$0xff]  ;;  %v133_v11 = vsel %vm131_vm1, %v479_v4, 0  ;;  %v210_v27 = vshrl.u32 %v209_v24, 7  ;;  %s378_s30 = sshll.u32 %s638_s4, 4  ;;  %s379_s30 = int_to_ptr.vmem [resolvable:$true] %s378_s30 }
  0x5f   :  { %429 = vmatprep.subr.bf16.mxu0 %v478_v1  ;;  %v480_v9 = vld [vmem:[#allocation8] sm:$0xff]   ;;  %v481_v10 = vld [vmem:[#allocation8 + $0x8] sm:$0xff]   ;;  %v91_v12 = vld [vmem:[#allocation2 + $0x28] sm:$0xff]  ;;  %v95_v13 = vpack.c.bf16 %v89_v7, %v88_v6  ;;  %s598_s6 = scalar_lea.vmem %s379_s30, 1024  ;;  %p603_p13 = scmp.lt.s32.totalorder %s379_s30, %s379_s30 }
  0x60   :  { %433 = vmatprep.mubr.msk.bf16.mxu0 %vm118_vm0, %v94_v5  ;;  %441 = vmatprep.subr.bf16.mxu1 %v480_v9  ;;  %v482_v14 = vld [vmem:[#allocation8 + $0x10] sm:$0xff]   ;;  %v96_v15 = vpack.c.bf16 %v91_v12, %v90_v8  ;;  %v483_v16 = vld [vmem:[#allocation8 + $0x18] sm:$0xff]   ;;  %v93_v18 = vld [vmem:[#allocation2 + $0x38] sm:$0xff]  ;;  %v211_v29 = vsub.s32 0, %v210_v27  ;;  %p599_p12 = scmp.ne.s32.totalorder %s379_s30, %s598_s6  ;;  %p604_p0 = scmp.lt.s32.totalorder %s598_s6, %s598_s6 }
  0x61   :  { %442 = vmatpush3.bf16.msra.mxu1 %v480_v9  ;;  %v92_v17 = vld [vmem:[#allocation2 + $0x30] sm:$0xff]  ;;  %v485_v21 = vld [vmem:[#allocation8 + $0x28] sm:$0xff]   ;;  %v486_v22 = vld [vmem:[#allocation8 + $0x30] sm:$0xff]  }
  0x62   :  { %430 = vmatpush3.bf16.msra.mxu0 %v478_v1  ;;  %443 = vmatprep.subr.bf16.mxu1 %v481_v10  ;;  %v97_v19 = vpack.c.bf16 %v93_v18, %v92_v17  ;;  %v484_v20 = vld [vmem:[#allocation8 + $0x20] sm:$0xff]   ;;  %v487_v23 = vld [vmem:[#allocation8 + $0x38] sm:$0xff]   ;;  %p605_p1 = por %p604_p0, %p603_p13 }
  0x63   :  { %465 = vmatprep.subr.msk.bf16.mxu0 %vm131_vm1, %v479_v4  ;;  %v204_v25 = vld [vmem:[#allocation7] sm:$0x1]  ;;  %v399_v52 = vld [vmem:[#allocation10] ss:$0 sm:$0xff] }
  0x64   :  { %v205_v26 = vpack.c.bf16 %v204_v25, %v204_v25  ;;  %p606_p2 = pnand %p605_p1, %p599_p12 }
  0x65   :  { %444 = vmatpush3.bf16.msra.mxu1 %v481_v10 }
  0x66   :  { %432 = vmatpush3.bf16.msra.mxu0 %v133_v11  ;;  %445 = vmatprep.subr.bf16.mxu1 %v482_v14  ;;  %v207_v28 = vpack.i.b16 %v205_v26, %v205_v26 }
  0x68   :  { %v212_v32 = vrot.slane %v207_v28, %v211_v29 }
  0x69   :  { %434 = vmatmul.mubr.msk.bf16.vlgmr.msra.gmra.mrb[0].mxu0 %vm118_vm0, %v95_v13  ;;  %446 = vmatpush3.bf16.msra.mxu1 %v482_v14 }
  0x6a   :  { %437 = vmatprep.mubr.msk.bf16.mxu0 %vm118_vm0, %v96_v15  ;;  %447 = vmatprep.subr.bf16.mxu1 %v483_v16 }
  0x6d   :  { %448 = vmatpush3.bf16.msra.mxu1 %v483_v16 }
  0x6e   :  { %449 = vmatprep.subr.bf16.mxu1 %v484_v20 }
  0x71   :  { %438 = vmatmul.mubr.msk.bf16.gmra.mrb[4].mxu0 %vm118_vm0, %v97_v19  ;;  %450 = vmatpush3.bf16.msra.mxu1 %v484_v20 }
  0x72   :  { %451 = vmatprep.subr.bf16.mxu1 %v485_v21 }
  0x75   :  { %452 = vmatpush3.bf16.msra.mxu1 %v485_v21 }
  0x76   :  { %453 = vmatprep.subr.bf16.mxu1 %v486_v22 }
  0x79   :  { %454 = vmatpush3.bf16.msra.mxu1 %v486_v22 }
  0x7a   :  { %455 = vmatprep.subr.bf16.mxu1 %v487_v23 }
  0x7d   :  { %456 = vmatpush3.bf16.msra.mxu1 %v487_v23 }
 0x13c   :  { %v435_v30 = vpop.f32.mrb[0].mxu0 }
 0x13d   :  { %v169_v31 = vpop.f32.mrb[1].mxu0 }
 0x13e   :  { %v436_v33 = vpop.f32.mrb[2].mxu0 }
 0x13f   :  { %v201_v34 = vpack.c.bf16 %v436_v33, %v435_v30  ;;  %v172_v35 = vpop.f32.mrb[3].mxu0 }
 0x140   :  { %v200_v36 = vpack.c.bf16 %v172_v35, %v169_v31 }
 0x141   :  { %v214_v37 = vadd.bf16 %v212_v32, %v201_v34 }
 0x142   :  { %v213_v38 = vadd.bf16 %v212_v32, %v200_v36 }
 0x143   :  { %v218_v43 = vmax.bf16 %v637_v40, %v214_v37 }
 0x144   :  { %v439_v39 = vpop.f32.mrb[4].mxu0  ;;  %v217_v41 = vmax.bf16 %v637_v40, %v213_v38 }
 0x145   :  { %v185_v42 = vpop.f32.mrb[5].mxu0 }
 0x146   :  { %v440_v44 = vpop.f32.mrb[6].mxu0  ;;  %457 = vmatprep.mubr.bf16.mxu1 %v217_v41 }
 0x147   :  { %v203_v45 = vpack.c.bf16 %v440_v44, %v439_v39  ;;  %v188_v46 = vpop.f32.mrb[7].mxu0  ;;  %458 = vmatmul.mubr.bf16.vlgmr.msra.gmra.mrb[0].mxu1 %v218_v43 }
 0x148   :  { %v202_v47 = vpack.c.bf16 %v188_v46, %v185_v42 }
 0x149   :  { %v216_v48 = vadd.bf16 %v212_v32, %v203_v45 }
 0x14a   :  { %v215_v49 = vadd.bf16 %v212_v32, %v202_v47 }
 0x14b   :  { %v220_v51 = vmax.bf16 %v637_v40, %v216_v48 }
 0x14c   :  { %v219_v50 = vmax.bf16 %v637_v40, %v215_v49 }
 0x14e   :  { %461 = vmatprep.mubr.bf16.mxu1 %v219_v50 }
 0x14f   :  { %462 = vmatmul.mubr.bf16.gmra.mrb[4].mxu1 %v220_v51 }
 0x21a   :  { %v459_v53 = vpop.f32.mrb[0].mxu1 }
 0x21b   :  { %v335_v54 = vadd.f32 %v459_v53, %v399_v52  ;;  %v326_v55 = vpop.f32.mrb[1].mxu1 }
 0x21c   :  { %v327_v56 = vadd.f32 %v399_v52, %v326_v55  ;;  %v460_v57 = vpop.f32.mrb[2].mxu1 }
 0x21d   :  { %v359_v58 = vmax.f32 %v335_v54, 0.0  ;;  %v338_v59 = vadd.f32 %v460_v57, %v399_v52  ;;  %v329_v60 = vpop.f32.mrb[3].mxu1 }
 0x21e   :  { %v357_v61 = vmax.f32 %v327_v56, 0.0  ;;  %v330_v62 = vadd.f32 %v399_v52, %v329_v60 }
 0x21f   :  { %367 = vst [vmem:[#allocation11 + $0x10] sm:$0xff] %v359_v58  ;;  %v360_v63 = vmax.f32 %v338_v59, 0.0 }
 0x220   :  { %365 = vst [vmem:[#allocation11] sm:$0xff] %v357_v61  ;;  %v358_v0 = vmax.f32 %v330_v62, 0.0 }
 0x221   :  { %368 = vst [vmem:[#allocation11 + $0x18] sm:$0xff] %v360_v63 }
 0x222   :  { %366 = vst [vmem:[#allocation11 + $0x8] sm:$0xff] %v358_v0  ;;  %v463_v1 = vpop.f32.mrb[4].mxu1 }
 0x223   :  { %v351_v2 = vadd.f32 %v463_v1, %v399_v52  ;;  %v342_v3 = vpop.f32.mrb[5].mxu1 }
 0x224   :  { %v343_v4 = vadd.f32 %v399_v52, %v342_v3  ;;  %v464_v5 = vpop.f32.mrb[6].mxu1 }
 0x225   :  { %v363_v6 = vmax.f32 %v351_v2, 0.0  ;;  %v354_v7 = vadd.f32 %v464_v5, %v399_v52  ;;  %v345_v8 = vpop.f32.mrb[7].mxu1 }
 0x226   :  { %v361_v9 = vmax.f32 %v343_v4, 0.0  ;;  %v346_v10 = vadd.f32 %v399_v52, %v345_v8 }
 0x227   :  { %371 = vst [vmem:[#allocation11 + $0x30] sm:$0xff] %v363_v6  ;;  %v364_v11 = vmax.f32 %v354_v7, 0.0 }
 0x228   :  { %369 = vst [vmem:[#allocation11 + $0x20] sm:$0xff] %v361_v9  ;;  %v362_v12 = vmax.f32 %v346_v10, 0.0 }
 0x229   :  { %372 = vst [vmem:[#allocation11 + $0x38] sm:$0xff] %v364_v11 }
 0x22a   :  { %370 = vst [vmem:[#allocation11 + $0x28] sm:$0xff] %v362_v12 }
 0x22b   :  { %609 = shalt.err (!%p606_p2)
}
 0x22c   :  { %s610_s9 = scalar_lea.hbm %s756_s5, 1024 }
 0x22d   :  { %p611_p3 = scmp.ne.s32.totalorder %s756_s5, %s610_s9  ;;  %p614_p4 = scmp.lt.u32.totalorder %s610_s9, %s756_s5 }
 0x22f   :  { %p616_p5 = pnand %p614_p4, %p611_p3 }
 0x231   :  { %619 = shalt.err (!%p616_p5)
}
 0x232   :  { %384 = dma.vmem_to_hbm [thread:$0]  %s379_s30, 1024, %s756_s5, [#allocation4], %s633_s3, %s633_s3, %s634_s28  }
 0x233   :  { %626 = dma.done.wait [#allocation4], 1024  }
 0x234   :  { %627 = vsyncadd [#allocation4], 4294966272 }
 0x235   :  { %388 = vsyncpa [#allocation3], 1 }
 0x236   :  { %389 = vsyncpa [#allocation6], 1 }
 0x237   :  { %390 = vsyncpa [#allocation9], 1 }
 0x238   :  { %391 = vsyncpa [#allocation4], 1 }

</bundles_post_ra>
